<compile_context>
chip_gen: v6e
topology: v6e:2x2x1
jax: 0.10.0
libtpu: 0.0.40
codegen_flags: <defaults>
</compile_context>

<pallas_src>
import jax
import jax.numpy as jnp
from jax.experimental import pallas as pl
from jax.experimental.pallas import tpu as pltpu

CMP_DIM = 10
NUM_PRIM = 3                      # pos_x, pos_y, pos_z
OUT_DIM = NUM_PRIM * CMP_DIM      # 30

_MAX_TILE_ROWS = 4096             # grouped rows / grid step (VMEM-bounded)
_MIN_TILE_ROWS = 256
_TARGET_STEPS = 8                 # >= 8 steps on big inputs -> v7x megacore


# ----------------------------- Pallas kernel --------------------------------
def _ineq_kernel(x_ref, sel_ref, thr_ref, out_ref):
    """Fused Inequality primitive, rows on the sublane axis.

    x_ref   : VMEM (tile, G*S)      input dtype   (grouped state rows)
    sel_ref : VMEM (G*S, G*30)      f32           (0.5*beta on block-diag sel)
    thr_ref : VMEM (1,   G*30)      f32           (0.5*beta*thresh, tiled)
    out_ref : VMEM (tile, G*30)     output dtype
    """
    x = x_ref[...].astype(jnp.float32)
    # 3 -> 30 channel expansion (and *0.5*beta) on the idle MXU.
    h = jnp.dot(x, sel_ref[...],
                preferred_element_type=jnp.float32,
                precision=jax.lax.Precision.HIGHEST)
    h = h - thr_ref[...]
    # sigmoid(z) = 0.5*tanh(z/2) + 0.5 ; h already holds z/2.  Saturates to
    # exactly 0/1 for large |z| (correct sigmoid limits, no overflow path).
    out_ref[...] = (0.5 * jnp.tanh(h) + 0.5).astype(out_ref.dtype)


def _pick_tile(rows):
    """Grouped-row tile: multiple of 8, >=8 grid steps when rows are plentiful."""
    if rows <= _MIN_TILE_ROWS:
        return rows                                  # single full block
    t = max(_MIN_TILE_ROWS, rows // _TARGET_STEPS)
    t = min(t, _MAX_TILE_ROWS)
    return (t // 8) * 8


# ------------------------------- wrapper -------------------------------------
@jax.jit
def unary_primitives_toyota_joint(states, thresh, beta=0.0):
    """
    :param states: [B, L, J, S] (S >= 3), any float dtype
    :param thresh: [3, cmp_dim] float32 (Inequality.thresh for pos_x/y/z)
    :param beta:   scalar
    :return: [B, L, J, 3*cmp_dim] in states.dtype
    """
    B, L, J, S = states.shape
    assert S >= NUM_PRIM, "state_dim must hold at least x,y,z"
    cmp = thresh.shape[1]
    out_dim = NUM_PRIM * cmp
    M = B * L * J

    # Group 8 rows per sublane-row when possible -> dense 240-lane blocks.
    group = 8 if M % 8 == 0 else 1
    rows = M // group
    in_w = group * S
    out_w = group * out_dim

    # Free, row-major reshape: no transpose, no copy.
    x2d = states.reshape(rows, in_w)

    half_beta = 0.5 * jnp.asarray(beta, jnp.float32)

    # Selection matrix: picks channel c of each grouped row into its 10 output
    # columns, scaled by 0.5*beta.  Extra state dims (s >= 3) map to zero rows.
    base = jnp.repeat(jnp.eye(NUM_PRIM, dtype=jnp.float32), cmp, axis=1)   # [3, out_dim]
    base_s = jnp.zeros((S, out_dim), jnp.float32).at[:NUM_PRIM, :].set(base)
    sel = jnp.kron(jnp.eye(group, dtype=jnp.float32), base_s) * half_beta  # [G*S, G*out]
    thr_g = jnp.tile(thresh.astype(jnp.float32).reshape(1, out_dim),
                     (1, group)) * half_beta                               # [1, G*out]

    tile = _pick_tile(rows)
    grid = pl.cdiv(rows, tile)

    out2d = pl.pallas_call(
        _ineq_kernel,
        out_shape=jax.ShapeDtypeStruct((rows, out_w), states.dtype),
        grid_spec=pl.GridSpec(
            grid=(grid,),
            in_specs=[
                pl.BlockSpec((tile, in_w), lambda i: (i, 0)),          # states rows
                pl.BlockSpec((group * S, out_w), lambda i: (0, 0)),    # sel (resident)
                pl.BlockSpec((1, out_w), lambda i: (0, 0)),            # thresh (resident)
            ],
            out_specs=pl.BlockSpec((tile, out_w), lambda i: (i, 0)),
        ),
        compiler_params=pltpu.CompilerParams(
            dimension_semantics=("parallel",),
            vmem_limit_bytes=32 * 1024 * 1024,
        ),
        cost_estimate=pl.CostEstimate(
            flops=2 * M * S * out_dim * group + 3 * M * out_dim,
            transcendentals=M * out_dim,
            bytes_accessed=M * (S + out_dim) * 4,
        ),
    )(x2d, sel, thr_g)

    # Free bitcast reshape back to the module's output layout.
    return out2d.reshape(B, L, J, out_dim)


# ------------------------------ reference ------------------------------------
def reference_forward(states, thresh, beta):
    outs = []
    for c in range(NUM_PRIM):
        x = states[..., c][..., None]                       # [B, L, J, 1]
        outs.append(jax.nn.sigmoid((x - thresh[c]) * beta))
    return jnp.concatenate(outs, axis=-1)


if __name__ == "__main__":
    key = jax.random.PRNGKey(0)
    k_states, k_thresh = jax.random.split(key)

    B, L, J, S = 2, 8, 4, 3                  # states [batch, length, n_joints, state_dim]
    states = jax.random.normal(k_states, (B, L, J, S), dtype=jnp.float32)

    # Inequality(out_dim=CMP_DIM, distribution='uniform') -> thresh per primitive.
    thresh = jax.random.uniform(k_thresh, (NUM_PRIM, CMP_DIM),
                                dtype=jnp.float32, minval=-1.0, maxval=1.0)
    beta = 1.0

    out = jax.block_until_ready(unary_primitives_toyota_joint(states, thresh, beta))
    ref = reference_forward(states, thresh, beta)

    assert out.shape == (B, L, J, OUT_DIM), out.shape
    assert jnp.allclose(out, ref, atol=2e-3), float(jnp.max(jnp.abs(out - ref)))

    print("KERNEL_OK")
</pallas_src>

<mosaic_0001>
module attributes {stable_mosaic.version = 11 : i64} {
  func.func @_ineq_kernel(%arg0: i32, %arg1: memref<8x24xf32, #tpu.memory_space<vmem>>, %arg2: memref<24x240xf32, #tpu.memory_space<vmem>>, %arg3: memref<1x240xf32, #tpu.memory_space<vmem>>, %arg4: memref<8x240xf32, #tpu.memory_space<vmem>>) attributes {dimension_semantics = [#tpu.dimension_semantics<parallel>], iteration_bounds = array<i64: 1>, scalar_prefetch = 0 : i64, scratch_operands = 0 : i64, tpu.core_type = #tpu.core_type<tc>, window_params = [{transform_indices = @transform_0, window_bounds = array<i64: 8, 24>}, {pipeline_mode = #tpu.pipeline_mode<synchronous>, transform_indices = @transform_1, window_bounds = array<i64: 24, 240>}, {pipeline_mode = #tpu.pipeline_mode<synchronous>, transform_indices = @transform_2, window_bounds = array<i64: 1, 240>}, {transform_indices = @transform_3, window_bounds = array<i64: 8, 240>}]} {
    %c0 = arith.constant 0 : index
    %c0_0 = arith.constant 0 : index
    %0 = vector.load %arg1[%c0, %c0_0] : memref<8x24xf32, #tpu.memory_space<vmem>>, vector<8x24xf32>
    %c0_1 = arith.constant 0 : index
    %c0_2 = arith.constant 0 : index
    %1 = vector.load %arg2[%c0_1, %c0_2] : memref<24x240xf32, #tpu.memory_space<vmem>>, vector<24x240xf32>
    %cst = arith.constant dense<0.000000e+00> : vector<8x240xf32>
    %2 = tpu.matmul %0, %1, %cst {dimension_numbers = #tpu.dot_dimension_numbers<[1], [0], [0], [1], [0, 0, 1, 1], [], []>, precision = #tpu.contract_precision<fp32>} : vector<8x24xf32>, vector<24x240xf32>, vector<8x240xf32> -> vector<8x240xf32>
    %c0_3 = arith.constant 0 : index
    %c0_4 = arith.constant 0 : index
    %3 = vector.load %arg3[%c0_3, %c0_4] : memref<1x240xf32, #tpu.memory_space<vmem>>, vector<1x240xf32>
    %4 = vector.broadcast %3 : vector<1x240xf32> to vector<8x240xf32>
    %5 = arith.subf %2, %4 : vector<8x240xf32>
    %6 = math.tanh %5 : vector<8x240xf32>
    %cst_5 = arith.constant 5.000000e-01 : f32
    %7 = vector.broadcast %cst_5 : f32 to vector<8x240xf32>
    %8 = arith.mulf %7, %6 : vector<8x240xf32>
    %cst_6 = arith.constant 5.000000e-01 : f32
    %9 = vector.broadcast %cst_6 : f32 to vector<8x240xf32>
    %10 = arith.addf %8, %9 : vector<8x240xf32>
    %c0_7 = arith.constant 0 : index
    %c0_8 = arith.constant 0 : index
    %11 = vector.load %arg4[%c0_7, %c0_8] : memref<8x240xf32, #tpu.memory_space<vmem>>, vector<8x240xf32>
    tpu.vector_store %arg4[%c0_7, %c0_8], %10 {strides = array<i32>} : memref<8x240xf32, #tpu.memory_space<vmem>>, vector<8x240xf32>,
    return
  }
  func.func @transform_0(%arg0: i32) -> (i32, i32) {
    %c0_i32 = arith.constant 0 : i32
    %c0_i32_0 = arith.constant 0 : i32
    return %arg0, %c0_i32 : i32, i32
  }
  func.func @transform_1(%arg0: i32) -> (i32, i32) {
    %c0_i32 = arith.constant 0 : i32
    %c0_i32_0 = arith.constant 0 : i32
    %c0_i32_1 = arith.constant 0 : i32
    return %c0_i32, %c0_i32_0 : i32, i32
  }
  func.func @transform_2(%arg0: i32) -> (i32, i32) {
    %c0_i32 = arith.constant 0 : i32
    %c0_i32_0 = arith.constant 0 : i32
    %c0_i32_1 = arith.constant 0 : i32
    return %c0_i32, %c0_i32_0 : i32, i32
  }
  func.func @transform_3(%arg0: i32) -> (i32, i32) {
    %c0_i32 = arith.constant 0 : i32
    %c0_i32_0 = arith.constant 0 : i32
    return %arg0, %c0_i32 : i32, i32
  }
}

</mosaic_0001>

<bundles_post_ra>
// kernel: unary_primitives_toyota_joint.1
= control target key start
LH: loop header
LB: loop body
LE: loop exit
PB: predicated region body
PF: predicated region fallthrough
CT: control target
= control target key end

     0   :  { %v574_v3 = vmov 0.0   ;;  %vm21_vm0 = vcmask 195584   ;;  %v544_v47 = vlaneseq  ;;  %vm563_vm1 = vcmask 916480   ;;  %s674_s1 = inlined_call_operand.vmem [shape: f32[24,240], index: 1, kind: input, shape index: {}]   ;;  %s675_s0 = inlined_call_operand.vmem [shape: f32[8,24], index: 0, kind: input, shape index: {}]   ;;  %s676_s2 = inlined_call_operand.vmem [shape: f32[1,240], index: 2, kind: input, shape index: {}]   ;;  %s677_s3 = inlined_call_operand.vmem [shape: f32[8,240], index: 3, kind: output, shape index: {}]  }
   0x1   :  { %v20_v0 = vld [vmem:[%s674_s1 + $0x28] sm:$0xff]  ;;  %v19_v1 = vld [vmem:[%s674_s1 + $0x20] sm:$0xff]  ;;  %v18_v2 = vld [vmem:[%s674_s1 + $0x18] sm:$0xff]  ;;  %95 = vmatprep.mubr.f32.mxu0 %v574_v3  ;;  %201 = vmatprep.mubr.f32.mxu1 %v574_v3 }
   0x2   :  { %v606_v4 = vand.u32 4294901760, %v20_v0  ;;  %v608_v5 = vand.u32 4294901760, %v19_v1  ;;  %v610_v6 = vand.u32 4294901760, %v18_v2  ;;  %v17_v7 = vld [vmem:[%s674_s1 + $0x10] sm:$0xff]  ;;  %v16_v8 = vld [vmem:[%s674_s1 + $0x8] sm:$0xff]  ;;  %v15_v9 = vld [vmem:[%s674_s1] sm:$0xff] }
   0x3   :  { %v621_v10 = vand.u32 4294901760, %v17_v7  ;;  %v623_v11 = vand.u32 4294901760, %v16_v8  ;;  %v625_v12 = vand.u32 4294901760, %v15_v9  ;;  %v14_v13 = vld [vmem:[%s675_s0] sm:$0xff]  ;;  %v545_v52 = vshrl.u32 %v544_v47, 7 }
   0x4   :  { %52 = vmatprep.subr.mxu0 %v606_v4  ;;  %v134_v14 = vsub.f32 %v20_v0, %v606_v4  ;;  %v140_v15 = vsub.f32 %v19_v1, %v608_v5  ;;  %v146_v16 = vsub.f32 %v18_v2, %v610_v6  ;;  %v23_v17 = vsel %vm21_vm0, %v14_v13, 0  ;;  %v542_v61 = vld [vmem:[%s676_s2] sm:$0x3] }
   0x5   :  { %54 = vmatpush1.msra.mxu0 %v608_v5  ;;  %v636_v18 = vand.u32 4294901760, %v23_v17  ;;  %v152_v19 = vsub.f32 %v17_v7, %v621_v10  ;;  %v158_v20 = vsub.f32 %v16_v8, %v623_v11  ;;  %v164_v21 = vsub.f32 %v15_v9, %v625_v12 }
   0x6   :  { %56 = vmatprep.subr.mxu0 %v610_v6  ;;  %v135_v22 = vand.u32 4294901760, %v134_v14  ;;  %v141_v23 = vand.u32 4294901760, %v140_v15  ;;  %v147_v24 = vand.u32 4294901760, %v146_v16  ;;  %v546_v60 = vsub.s32 0, %v545_v52 }
   0x7   :  { %58 = vmatpush1.msra.mxu0 %v621_v10  ;;  %v97_v25 = vsub.f32 %v23_v17, %v636_v18  ;;  %v153_v26 = vand.u32 4294901760, %v152_v19  ;;  %v159_v27 = vand.u32 4294901760, %v158_v20  ;;  %v165_v28 = vand.u32 4294901760, %v164_v21 }
   0x8   :  { %60 = vmatprep.subr.mxu0 %v623_v11  ;;  %v136_v29 = vsub.f32 %v134_v14, %v135_v22  ;;  %v142_v30 = vsub.f32 %v140_v15, %v141_v23  ;;  %v148_v31 = vsub.f32 %v146_v16, %v147_v24  ;;  %v550_v63 = vsub.s32 1, %v545_v52 }
   0x9   :  { %62 = vmatpush1.msra.mxu0 %v625_v12  ;;  %v98_v32 = vand.u32 4294901760, %v97_v25  ;;  %v154_v33 = vsub.f32 %v152_v19, %v153_v26  ;;  %v160_v34 = vsub.f32 %v158_v20, %v159_v27  ;;  %v166_v35 = vsub.f32 %v164_v21, %v165_v28 }
   0xa   :  { %v137_v36 = vand.u32 4294901760, %v136_v29  ;;  %v143_v37 = vand.u32 4294901760, %v142_v30  ;;  %v149_v38 = vand.u32 4294901760, %v148_v31  ;;  %237 = vmatprep.subr.mxu0 %v134_v14  ;;  %v547_v2 = vrot.slane %v542_v61, %v546_v60 }
   0xb   :  { %v99_v39 = vsub.f32 %v97_v25, %v98_v32  ;;  %v155_v40 = vand.u32 4294901760, %v154_v33  ;;  %v161_v41 = vand.u32 4294901760, %v160_v34  ;;  %v167_v43 = vand.u32 4294901760, %v166_v35 }
   0xc   :  { %138 = vmatprep.subr.mxu1 %v137_v36 }
   0xd   :  { %144 = vmatpush1.msra.mxu1 %v143_v37  ;;  %v100_v42 = vand.u32 4294901760, %v99_v39 }
   0xe   :  { %150 = vmatprep.subr.mxu1 %v149_v38 }
   0xf   :  { %101 = vmatmul.mubr.f32.vlgmr.msra.gmra.mxu0 %v100_v42  ;;  %156 = vmatpush1.msra.mxu1 %v155_v40 }
  0x10   :  { %240 = vmatpush1.msra.mxu0 %v140_v15  ;;  %162 = vmatprep.subr.mxu1 %v161_v41 }
  0x11   :  { %243 = vmatprep.subr.mxu0 %v146_v16  ;;  %168 = vmatpush1.msra.mxu1 %v167_v43 }
  0x12   :  { %246 = vmatpush1.msra.mxu0 %v152_v19  ;;  %203 = vmatmul.mubr.f32.vlgmr.msra.gmra.mxu1 %v636_v18 }
  0x13   :  { %249 = vmatprep.subr.mxu0 %v158_v20  ;;  %321 = vmatprep.subr.mxu1 %v606_v4 }
  0x14   :  { %252 = vmatpush1.msra.mxu0 %v164_v21  ;;  %285 = vmatprep.mubr.f32.mxu0 %v574_v3 }
  0x15   :  { %323 = vmatpush1.msra.mxu1 %v608_v5  ;;  %288 = vmatmul.mubr.f32.vlgmr.msra.gmra.mxu0 %v97_v25 }
  0x16   :  { %325 = vmatprep.subr.mxu1 %v610_v6  ;;  %403 = vmatprep.subr.mxu0 %v135_v22 }
  0x17   :  { %327 = vmatpush1.msra.mxu1 %v621_v10  ;;  %407 = vmatpush1.msra.mxu0 %v141_v23 }
  0x18   :  { %329 = vmatprep.subr.mxu1 %v623_v11  ;;  %411 = vmatprep.subr.mxu0 %v147_v24 }
  0x19   :  { %331 = vmatpush1.msra.mxu1 %v625_v12  ;;  %364 = vmatprep.mubr.f32.mxu1 %v574_v3 }
  0x1a   :  { %415 = vmatpush1.msra.mxu0 %v153_v26  ;;  %368 = vmatmul.mubr.f32.vlgmr.msra.gmra.mxu1 %v98_v32 }
  0x1b   :  { %419 = vmatprep.subr.mxu0 %v159_v27  ;;  %491 = vmatprep.subr.mxu1 %v606_v4 }
  0x1c   :  { %423 = vmatpush1.msra.mxu0 %v165_v28  ;;  %456 = vmatprep.mubr.f32.mxu0 %v574_v3 }
  0x1d   :  { %493 = vmatpush1.msra.mxu1 %v608_v5  ;;  %458 = vmatmul.mubr.f32.vlgmr.msra.gmra.mxu0 %v636_v18 }
  0x1e   :  { %495 = vmatprep.subr.mxu1 %v610_v6  ;;  %534 = vmatprep.mubr.f32.mxu1 %v574_v3  ;;  %v551_v6 = vrot.slane %v542_v61, %v550_v63 }
  0x1f   :  { %497 = vmatpush1.msra.mxu1 %v621_v10 }
  0x20   :  { %499 = vmatprep.subr.mxu1 %v623_v11 }
  0x21   :  { %501 = vmatpush1.msra.mxu1 %v625_v12 }
  0x22   :  { %536 = vmatmul.mubr.f32.vlgmr.msra.gmra.mxu1 %v636_v18 }
  0xcf   :  { %v102_v44 = vpop.f32.mrf.mxu0 }
  0xd1   :  { %v104_v45 = vpop.f32.mrf.mxu0 }
  0xd2   :  { %v204_v46 = vpop.f32.mrf.mxu1 }
  0xd3   :  { %v205_v50 = vadd.f32 %v204_v46, %v102_v44 }
  0xd4   :  { %v206_v48 = vpop.f32.mrf.mxu1 }
  0xd5   :  { %v289_v49 = vpop.f32.mrf.mxu0  ;;  %v207_v51 = vadd.f32 %v206_v48, %v104_v45 }
  0xd6   :  { %v290_v55 = vadd.f32 %v289_v49, %v205_v50 }
  0xd7   :  { %v291_v53 = vpop.f32.mrf.mxu0 }
  0xd8   :  { %v292_v57 = vadd.f32 %v291_v53, %v207_v51 }
  0xda   :  { %v369_v54 = vpop.f32.mrf.mxu1 }
  0xdb   :  { %v370_v58 = vadd.f32 %v369_v54, %v290_v55 }
  0xdc   :  { %v371_v56 = vpop.f32.mrf.mxu1 }
  0xdd   :  { %v459_v59 = vpop.f32.mrf.mxu0  ;;  %v372_v62 = vadd.f32 %v371_v56, %v292_v57 }
  0xde   :  { %v460_v1 = vadd.f32 %v459_v59, %v370_v58 }
  0xdf   :  { %v461_v0 = vpop.f32.mrf.mxu0 }
  0xe0   :  { %v462_v4 = vadd.f32 %v461_v0, %v372_v62 }
  0xe2   :  { %v537_v3 = vpop.f32.mrf.mxu1 }
  0xe3   :  { %v538_v5 = vadd.f32 %v537_v3, %v460_v1 }
  0xe4   :  { %v539_v7 = vpop.f32.mrf.mxu1 }
  0xe5   :  { %v554_v8 = vsub.f32 %v538_v5, %v547_v2  ;;  %v540_v9 = vadd.f32 %v539_v7, %v462_v4 }
  0xe7   :  { %570 = vtanh.f32 %v554_v8  ;;  %v555_v10 = vsub.f32 %v540_v9, %v551_v6 }
  0xe9   :  { %572 = vtanh.f32 %v555_v10 }
  0xf4   :  { %v571_v11 = vpop.eup %570 }
  0xf5   :  { %v558_v12 = vmul.f32 0.5, %v571_v11 }
  0xf6   :  { %v573_v13 = vpop.eup %572 }
  0xf7   :  { %v560_v14 = vadd.f32 0.5, %v558_v12  ;;  %v559_v15 = vmul.f32 0.5, %v573_v13 }
  0xf9   :  { %562 = vst [vmem:[%s677_s3] sm:$0xff] %v560_v14  ;;  %v561_v16 = vadd.f32 0.5, %v559_v15 }
  0xfb   :  { %564 = vst.msk [vmem:[%s677_s3 + $0x8] sm:$0xff] %vm563_vm1, %v561_v16 }

</bundles_post_ra>
